<compile_context>
chip_gen: v5e
topology: v5e:2x2
jax: 0.10.0
libtpu: 0.0.40
codegen_flags: <defaults>
</compile_context>

<pallas_src>
import functools
import math

import numpy as np
import jax
import jax.numpy as jnp
from jax.experimental import pallas as pl
from jax.experimental.pallas import tpu as pltpu


def _round_up(x, m):
    return (x + m - 1) // m * m


def _softplus(x):
    # numerically stable softplus (activation='softplus' in make_y_net); EUP ops.
    return jnp.maximum(x, 0.0) + jnp.log1p(jnp.exp(-jnp.abs(x)))


def _stack_kernel(num_layers, activate_last, t_ref, x_ref, *refs):
    """Fused stack of ConcatLinear_v2 layers (+ softplus between layers).

    t_ref : (1,) scalar time in SMEM
    x_ref : (TB, Din) batch tile of x (pipelined over the batch grid)
    refs  : per layer (w_ref (Din_l, Dout_l_p), b_ref (1, Dout_l_p),
            hb_ref (1, Dout_l_p)), followed by o_ref (TB, Dout_last_p).
    Weight / bias refs are VMEM-resident across the whole grid (index_map const).
    Intermediate activations never leave VMEM.
    """
    o_ref = refs[3 * num_layers]
    t = t_ref[0]
    h = x_ref[...]
    for l in range(num_layers):
        w_ref = refs[3 * l]
        b_ref = refs[3 * l + 1]
        hb_ref = refs[3 * l + 2]
        bias_row = b_ref[...] + t * hb_ref[...]                    # (1, dout_p), f32
        y = jnp.dot(h.astype(w_ref.dtype), w_ref[...],
                    preferred_element_type=jnp.float32)            # MXU, f32 acc
        y = y + bias_row
        if l < num_layers - 1 or activate_last:
            y = _softplus(y)
        h = y
    o_ref[...] = h.astype(o_ref.dtype)


def prepare_concat_linear_stack(layer_weights, *, compute_dtype=jnp.bfloat16,
                                activate_last=False):
    """One-time weight preparation (hoisted out of the per-call path).

    layer_weights: sequence of (W, b, hb_W) with W (dout, din), b (dout,),
    hb_W (dout, 1) or None (plain Linear, i.e. hyper-bias weight == 0).
    Layer l's input dim must equal layer l-1's output dim.  Output dims are
    padded to multiples of 128 (lane-dense stores, MXU-friendly); the first
    layer's input dim stays unpadded so x needs no per-call feature pad.
    """
    compute_dtype = jnp.dtype(compute_dtype)
    ws, bs, hbs, dims = [], [], [], []
    prev_out_p = None
    prev_out = None
    for idx, (W, b, hb) in enumerate(layer_weights):
        W = jnp.asarray(W, jnp.float32)
        b = jnp.asarray(b, jnp.float32)
        dout, din = W.shape
        if idx == 0:
            din_p = din
        else:
            assert din == prev_out, "layer input dim must match previous output dim"
            din_p = prev_out_p
        dout_p = _round_up(dout, 128)
        w_p = jnp.pad(W.T, ((0, din_p - din), (0, dout_p - dout))).astype(compute_dtype)
        b_row = jnp.pad(b.reshape(1, dout), ((0, 0), (0, dout_p - dout)))
        if hb is None:
            hb_row = jnp.zeros((1, dout_p), jnp.float32)
        else:
            hb_row = jnp.pad(jnp.asarray(hb, jnp.float32).reshape(dout, 1).T,
                             ((0, 0), (0, dout_p - dout)))
        ws.append(w_p)
        bs.append(b_row)
        hbs.append(hb_row)
        dims.append((din, dout))
        prev_out_p, prev_out = dout_p, dout
    return {"w": ws, "b": bs, "hb": hbs, "dims": dims,
            "din": dims[0][0], "dout": dims[-1][1],
            "activate_last": bool(activate_last)}


def _vmem_capacity_bytes():
    try:
        info_fn = getattr(pltpu, "get_tpu_info", None)
        if info_fn is not None:
            cap = getattr(info_fn(), "vmem_capacity_bytes", None)
            if cap:
                return int(cap)
    except Exception:
        pass
    return 64 * 1024 * 1024   # conservative default (v7x per-TC VMEM)


def concat_linear_stack(t, x, params, *, block_b=512):
    """y = fused stack of (x @ W.T + b + t * Hw.T [+ softplus]) with scalar t."""
    t = jnp.asarray(t, jnp.float32)
    assert t.size == 1, "scalar t only (BaselineYNet always uses t = 0.0)"
    t_arr = jnp.reshape(t, (1,))

    B, din = x.shape
    assert din == params["din"], f"expected input dim {params['din']}, got {din}"
    ws, bs, hbs = params["w"], params["b"], params["hb"]
    num_layers = len(ws)
    dout_last_p = ws[-1].shape[1]
    out_dtype = x.dtype
    x_isz = jnp.dtype(x.dtype).itemsize
    o_isz = jnp.dtype(out_dtype).itemsize

    w_bytes = sum(int(np.prod(w.shape)) * w.dtype.itemsize for w in ws)
    row_bytes = sum(b.shape[1] * 4 + hb.shape[1] * 4 for b, hb in zip(bs, hbs))
    max_width = max(w.shape[1] for w in ws)

    # --- batch-tile selection -------------------------------------------------
    # sublane alignment: 8 for 32-bit refs, 16 if any pipelined ref is sub-32-bit
    sub32 = (x_isz < 4) or (o_isz < 4) or any(w.dtype.itemsize < 4 for w in ws)
    align = 16 if sub32 else 8
    # aim for >= 4 grid steps (2 TensorCores x 2 pipelined steps) when B allows
    tb = min(int(block_b), _round_up(max((B + 3) // 4, 1), align))
    tb = max(align, min(tb, _round_up(B, align)))
    tb = _round_up(tb, align)

    vmem_cap = _vmem_capacity_bytes()
    vmem_budget = max(16 << 20, min(vmem_cap // 2 - (8 << 20), 96 << 20))

    def vmem_est(tile_b):
        # Pallas double-buffers every pipelined input/output, including the
        # constant-index ("resident") weight/bias blocks -> count 2x everywhere.
        return (2 * tile_b * din * x_isz                 # x tiles
                + 2 * tile_b * dout_last_p * o_isz       # out tiles
                + 2 * (w_bytes + row_bytes)              # resident W^T / bias rows
                + 2 * tile_b * max_width * 4)            # live f32 activations

    while tb > align and vmem_est(tb) > vmem_budget:
        tb = _round_up(max(tb // 2, align), align)       # stays a multiple of align

    b_p = _round_up(B, tb)
    x_p = x if b_p == B else jnp.pad(x, ((0, b_p - B), (0, 0)))

    # --- specs / pallas_call ----------------------------------------------------
    in_specs = [pl.BlockSpec(memory_space=pltpu.SMEM),              # t scalar
                pl.BlockSpec((tb, din), lambda i: (i, 0))]          # x batch tile
    inputs = [t_arr, x_p]
    for w, brow, hbrow in zip(ws, bs, hbs):
        in_specs.append(pl.BlockSpec(w.shape, lambda i: (0, 0)))    # W^T resident
        in_specs.append(pl.BlockSpec(brow.shape, lambda i: (0, 0)))
        in_specs.append(pl.BlockSpec(hbrow.shape, lambda i: (0, 0)))
        inputs.extend((w, brow, hbrow))

    # advisory cost estimate (helps XLA schedule the surrounding ops)
    flops = 2 * B * sum(di * do for di, do in params["dims"])
    n_act = num_layers - (0 if params["activate_last"] else 1)
    transc = 2 * B * sum(do for _, do in params["dims"][:n_act])
    bytes_acc = B * din * x_isz + B * dout_last_p * o_isz + w_bytes + row_bytes

    vmem_limit = int(min(max(vmem_est(tb) + (8 << 20), 32 << 20),
                         max(vmem_cap * 5 // 8, 32 << 20)))

    out_p = pl.pallas_call(
        functools.partial(_stack_kernel, num_layers, params["activate_last"]),
        out_shape=jax.ShapeDtypeStruct((b_p, dout_last_p), out_dtype),
        grid=(b_p // tb,),
        in_specs=in_specs,
        out_specs=pl.BlockSpec((tb, dout_last_p), lambda i: (i, 0)),
        compiler_params=pltpu.CompilerParams(
            dimension_semantics=("parallel",),     # batch tiles shard across TCs
            vmem_limit_bytes=vmem_limit,
        ),
        cost_estimate=pl.CostEstimate(flops=int(flops),
                                      transcendentals=int(transc),
                                      bytes_accessed=int(bytes_acc)),
    )(*inputs)

    return out_p[:B, :params["dout"]]


def make_baseline_ynet_projection(PW, Pb, *, compute_dtype=jnp.float32):
    """BaselineYNet.projection = nn.Sequential(nn.Flatten(), nn.Linear(...))."""
    hb0 = jnp.zeros((PW.shape[0], 1), jnp.float32)   # hyper-bias weight init 0.0
    return prepare_concat_linear_stack([(PW, Pb, hb0)],
                                       compute_dtype=compute_dtype,
                                       activate_last=False)


def baseline_ynet_head(features, proj_params, *, residual=False, y=None):
    """BaselineYNet.forward tail: flatten -> (optional residual) -> projection.

    Returns (logits, 0.0) like the PyTorch module (t = y.new_tensor(0.0)).
    """
    # TODO(synk): the conv-based ode_k3 blocks / ConvDownsample assembled by
    # make_y_net live in bayeSDE's external diffeq_layers module (not in the
    # spec); only the time-conditioned linear block and projection head are here.
    outs = features.reshape(features.shape[0], -1)          # nn.Flatten
    if residual and y is not None:
        outs = outs + y.reshape(y.shape[0], -1)
    logits = concat_linear_stack(0.0, outs, proj_params)
    return logits, jnp.float32(0.0)


if __name__ == "__main__":
    key = jax.random.PRNGKey(0)
    ks = jax.random.split(key, 12)

    def np_softplus(v):
        return np.maximum(v, 0.0) + np.log1p(np.exp(-np.abs(v)))

    # --- 1) fused 3-layer time-conditioned stack (ConcatLinear_v2 + softplus) ---
    B, d0 = 8, 64
    dims = [(64, 32), (32, 32), (32, 10)]
    layer_weights, np_layers = [], []
    for li, (din_l, dout_l) in enumerate(dims):
        bound = 1.0 / math.sqrt(din_l)
        W = jax.random.uniform(ks[3 * li], (dout_l, din_l), jnp.float32, -bound, bound)
        b = jax.random.uniform(ks[3 * li + 1], (dout_l,), jnp.float32, -bound, bound)
        hb = jax.random.normal(ks[3 * li + 2], (dout_l, 1), jnp.float32) * 0.1
        layer_weights.append((W, b, hb))
        np_layers.append((np.asarray(W), np.asarray(b), np.asarray(hb)))
    x = jax.random.normal(ks[9], (B, d0), jnp.float32)
    t = 0.37

    h = np.asarray(x)
    for li, (W, b, hb) in enumerate(np_layers):
        h = h @ W.T + b + t * hb.T
        if li < len(np_layers) - 1:
            h = np_softplus(h)
    ref = h

    # f32 compute: tight check
    params_f32 = prepare_concat_linear_stack(layer_weights, compute_dtype=jnp.float32)
    out_f32 = jax.block_until_ready(concat_linear_stack(t, x, params_f32))
    assert out_f32.shape == (B, dims[-1][1])
    assert np.allclose(np.asarray(out_f32), ref, atol=1e-3, rtol=1e-3)

    # default bf16 compute (f32 accumulation): looser tolerance
    params_bf16 = prepare_concat_linear_stack(layer_weights)
    out_bf16 = jax.block_until_ready(concat_linear_stack(t, x, params_bf16))
    assert np.allclose(np.asarray(out_bf16), ref, atol=1.5e-1, rtol=5e-2)

    # --- 2) BaselineYNet projection head: Flatten + Linear (t=0, hyper_bias=0) ---
    feat = jax.random.normal(ks[10], (2, 4, 8, 8), jnp.float32)   # "y_net output"
    num_classes = 10
    d_in = 4 * 8 * 8
    bound = 1.0 / math.sqrt(d_in)
    PW = jax.random.uniform(ks[11], (num_classes, d_in), jnp.float32, -bound, bound)
    Pb = jax.random.uniform(jax.random.fold_in(key, 99), (num_classes,),
                            jnp.float32, -bound, bound)
    proj_params = make_baseline_ynet_projection(PW, Pb, compute_dtype=jnp.float32)

    logits, aux = baseline_ynet_head(feat, proj_params)
    logits = jax.block_until_ready(logits)
    feat_flat = np.asarray(feat).reshape(2, -1)
    ref_logits = feat_flat @ np.asarray(PW).T + np.asarray(Pb)
    assert logits.shape == (2, num_classes)
    assert np.allclose(np.asarray(logits), ref_logits, atol=1e-3, rtol=1e-3)
    assert float(aux) == 0.0

    print("KERNEL_OK")
</pallas_src>

<mosaic_0001>
module attributes {stable_mosaic.version = 11 : i64} {
  func.func @_stack_kernel(%arg0: i32, %arg1: memref<1xf32, #tpu.memory_space<smem>>, %arg2: memref<8x64xf32, #tpu.memory_space<vmem>>, %arg3: memref<64x128xf32, #tpu.memory_space<vmem>>, %arg4: memref<1x128xf32, #tpu.memory_space<vmem>>, %arg5: memref<1x128xf32, #tpu.memory_space<vmem>>, %arg6: memref<128x128xf32, #tpu.memory_space<vmem>>, %arg7: memref<1x128xf32, #tpu.memory_space<vmem>>, %arg8: memref<1x128xf32, #tpu.memory_space<vmem>>, %arg9: memref<128x128xf32, #tpu.memory_space<vmem>>, %arg10: memref<1x128xf32, #tpu.memory_space<vmem>>, %arg11: memref<1x128xf32, #tpu.memory_space<vmem>>, %arg12: memref<8x128xf32, #tpu.memory_space<vmem>>) attributes {dimension_semantics = [#tpu.dimension_semantics<parallel>], iteration_bounds = array<i64: 1>, scalar_prefetch = 0 : i64, scratch_operands = 0 : i64, tpu.core_type = #tpu.core_type<tc>, window_params = [{transform_indices = @transform_0, window_bounds = array<i64: 1>}, {transform_indices = @transform_1, window_bounds = array<i64: 8, 64>}, {pipeline_mode = #tpu.pipeline_mode<synchronous>, transform_indices = @transform_2, window_bounds = array<i64: 64, 128>}, {pipeline_mode = #tpu.pipeline_mode<synchronous>, transform_indices = @transform_3, window_bounds = array<i64: 1, 128>}, {pipeline_mode = #tpu.pipeline_mode<synchronous>, transform_indices = @transform_4, window_bounds = array<i64: 1, 128>}, {pipeline_mode = #tpu.pipeline_mode<synchronous>, transform_indices = @transform_5, window_bounds = array<i64: 128, 128>}, {pipeline_mode = #tpu.pipeline_mode<synchronous>, transform_indices = @transform_6, window_bounds = array<i64: 1, 128>}, {pipeline_mode = #tpu.pipeline_mode<synchronous>, transform_indices = @transform_7, window_bounds = array<i64: 1, 128>}, {pipeline_mode = #tpu.pipeline_mode<synchronous>, transform_indices = @transform_8, window_bounds = array<i64: 128, 128>}, {pipeline_mode = #tpu.pipeline_mode<synchronous>, transform_indices = @transform_9, window_bounds = array<i64: 1, 128>}, {pipeline_mode = #tpu.pipeline_mode<synchronous>, transform_indices = @transform_10, window_bounds = array<i64: 1, 128>}, {transform_indices = @transform_11, window_bounds = array<i64: 8, 128>}]} {
    %c0 = arith.constant 0 : index
    %0 = memref.load %arg1[%c0] : memref<1xf32, #tpu.memory_space<smem>>
    %c0_0 = arith.constant 0 : index
    %c0_1 = arith.constant 0 : index
    %1 = vector.load %arg2[%c0_0, %c0_1] : memref<8x64xf32, #tpu.memory_space<vmem>>, vector<8x64xf32>
    %c0_2 = arith.constant 0 : index
    %c0_3 = arith.constant 0 : index
    %2 = vector.load %arg4[%c0_2, %c0_3] : memref<1x128xf32, #tpu.memory_space<vmem>>, vector<1x128xf32>
    %c0_4 = arith.constant 0 : index
    %c0_5 = arith.constant 0 : index
    %3 = vector.load %arg5[%c0_4, %c0_5] : memref<1x128xf32, #tpu.memory_space<vmem>>, vector<1x128xf32>
    %4 = vector.broadcast %0 : f32 to vector<1x128xf32>
    %5 = arith.mulf %4, %3 : vector<1x128xf32>
    %6 = arith.addf %2, %5 : vector<1x128xf32>
    %c0_6 = arith.constant 0 : index
    %c0_7 = arith.constant 0 : index
    %7 = vector.load %arg3[%c0_6, %c0_7] : memref<64x128xf32, #tpu.memory_space<vmem>>, vector<64x128xf32>
    %cst = arith.constant dense<0.000000e+00> : vector<8x128xf32>
    %8 = tpu.matmul %1, %7, %cst {dimension_numbers = #tpu.dot_dimension_numbers<[1], [0], [0], [1], [0, 0, 1, 1], [], []>} : vector<8x64xf32>, vector<64x128xf32>, vector<8x128xf32> -> vector<8x128xf32>
    %9 = vector.broadcast %6 : vector<1x128xf32> to vector<8x128xf32>
    %10 = arith.addf %8, %9 : vector<8x128xf32>
    %cst_8 = arith.constant 0.000000e+00 : f32
    %11 = vector.broadcast %cst_8 : f32 to vector<8x128xf32>
    %12 = arith.maximumf %10, %11 : vector<8x128xf32>
    %13 = math.absf %10 : vector<8x128xf32>
    %cst_9 = arith.constant 0.000000e+00 : f32
    %14 = vector.broadcast %cst_9 : f32 to vector<8x128xf32>
    %15 = arith.subf %14, %13 : vector<8x128xf32>
    %16 = math.exp %15 : vector<8x128xf32>
    %17 = math.log1p %16 : vector<8x128xf32>
    %18 = arith.addf %12, %17 : vector<8x128xf32>
    %c0_10 = arith.constant 0 : index
    %c0_11 = arith.constant 0 : index
    %19 = vector.load %arg7[%c0_10, %c0_11] : memref<1x128xf32, #tpu.memory_space<vmem>>, vector<1x128xf32>
    %c0_12 = arith.constant 0 : index
    %c0_13 = arith.constant 0 : index
    %20 = vector.load %arg8[%c0_12, %c0_13] : memref<1x128xf32, #tpu.memory_space<vmem>>, vector<1x128xf32>
    %21 = vector.broadcast %0 : f32 to vector<1x128xf32>
    %22 = arith.mulf %21, %20 : vector<1x128xf32>
    %23 = arith.addf %19, %22 : vector<1x128xf32>
    %c0_14 = arith.constant 0 : index
    %c0_15 = arith.constant 0 : index
    %24 = vector.load %arg6[%c0_14, %c0_15] : memref<128x128xf32, #tpu.memory_space<vmem>>, vector<128x128xf32>
    %cst_16 = arith.constant dense<0.000000e+00> : vector<8x128xf32>
    %25 = tpu.matmul %18, %24, %cst_16 {dimension_numbers = #tpu.dot_dimension_numbers<[1], [0], [0], [1], [0, 0, 1, 1], [], []>} : vector<8x128xf32>, vector<128x128xf32>, vector<8x128xf32> -> vector<8x128xf32>
    %26 = vector.broadcast %23 : vector<1x128xf32> to vector<8x128xf32>
    %27 = arith.addf %25, %26 : vector<8x128xf32>
    %cst_17 = arith.constant 0.000000e+00 : f32
    %28 = vector.broadcast %cst_17 : f32 to vector<8x128xf32>
    %29 = arith.maximumf %27, %28 : vector<8x128xf32>
    %30 = math.absf %27 : vector<8x128xf32>
    %cst_18 = arith.constant 0.000000e+00 : f32
    %31 = vector.broadcast %cst_18 : f32 to vector<8x128xf32>
    %32 = arith.subf %31, %30 : vector<8x128xf32>
    %33 = math.exp %32 : vector<8x128xf32>
    %34 = math.log1p %33 : vector<8x128xf32>
    %35 = arith.addf %29, %34 : vector<8x128xf32>
    %c0_19 = arith.constant 0 : index
    %c0_20 = arith.constant 0 : index
    %36 = vector.load %arg10[%c0_19, %c0_20] : memref<1x128xf32, #tpu.memory_space<vmem>>, vector<1x128xf32>
    %c0_21 = arith.constant 0 : index
    %c0_22 = arith.constant 0 : index
    %37 = vector.load %arg11[%c0_21, %c0_22] : memref<1x128xf32, #tpu.memory_space<vmem>>, vector<1x128xf32>
    %38 = vector.broadcast %0 : f32 to vector<1x128xf32>
    %39 = arith.mulf %38, %37 : vector<1x128xf32>
    %40 = arith.addf %36, %39 : vector<1x128xf32>
    %c0_23 = arith.constant 0 : index
    %c0_24 = arith.constant 0 : index
    %41 = vector.load %arg9[%c0_23, %c0_24] : memref<128x128xf32, #tpu.memory_space<vmem>>, vector<128x128xf32>
    %cst_25 = arith.constant dense<0.000000e+00> : vector<8x128xf32>
    %42 = tpu.matmul %35, %41, %cst_25 {dimension_numbers = #tpu.dot_dimension_numbers<[1], [0], [0], [1], [0, 0, 1, 1], [], []>} : vector<8x128xf32>, vector<128x128xf32>, vector<8x128xf32> -> vector<8x128xf32>
    %43 = vector.broadcast %40 : vector<1x128xf32> to vector<8x128xf32>
    %44 = arith.addf %42, %43 : vector<8x128xf32>
    %c0_26 = arith.constant 0 : index
    %c0_27 = arith.constant 0 : index
    %45 = vector.load %arg12[%c0_26, %c0_27] : memref<8x128xf32, #tpu.memory_space<vmem>>, vector<8x128xf32>
    tpu.vector_store %arg12[%c0_26, %c0_27], %44 {strides = array<i32>} : memref<8x128xf32, #tpu.memory_space<vmem>>, vector<8x128xf32>,
    return
  }
  func.func @transform_0(%arg0: i32) -> i32 {
    %c0_i32 = arith.constant 0 : i32
    %c0_i32_0 = arith.constant 0 : i32
    return %c0_i32 : i32
  }
  func.func @transform_1(%arg0: i32) -> (i32, i32) {
    %c0_i32 = arith.constant 0 : i32
    %c0_i32_0 = arith.constant 0 : i32
    return %arg0, %c0_i32 : i32, i32
  }
  func.func @transform_2(%arg0: i32) -> (i32, i32) {
    %c0_i32 = arith.constant 0 : i32
    %c0_i32_0 = arith.constant 0 : i32
    %c0_i32_1 = arith.constant 0 : i32
    return %c0_i32, %c0_i32_0 : i32, i32
  }
  func.func @transform_3(%arg0: i32) -> (i32, i32) {
    %c0_i32 = arith.constant 0 : i32
    %c0_i32_0 = arith.constant 0 : i32
    %c0_i32_1 = arith.constant 0 : i32
    return %c0_i32, %c0_i32_0 : i32, i32
  }
  func.func @transform_4(%arg0: i32) -> (i32, i32) {
    %c0_i32 = arith.constant 0 : i32
    %c0_i32_0 = arith.constant 0 : i32
    %c0_i32_1 = arith.constant 0 : i32
    return %c0_i32, %c0_i32_0 : i32, i32
  }
  func.func @transform_5(%arg0: i32) -> (i32, i32) {
    %c0_i32 = arith.constant 0 : i32
    %c0_i32_0 = arith.constant 0 : i32
    %c0_i32_1 = arith.constant 0 : i32
    return %c0_i32, %c0_i32_0 : i32, i32
  }
  func.func @transform_6(%arg0: i32) -> (i32, i32) {
    %c0_i32 = arith.constant 0 : i32
    %c0_i32_0 = arith.constant 0 : i32
    %c0_i32_1 = arith.constant 0 : i32
    return %c0_i32, %c0_i32_0 : i32, i32
  }
  func.func @transform_7(%arg0: i32) -> (i32, i32) {
    %c0_i32 = arith.constant 0 : i32
    %c0_i32_0 = arith.constant 0 : i32
    %c0_i32_1 = arith.constant 0 : i32
    return %c0_i32, %c0_i32_0 : i32, i32
  }
  func.func @transform_8(%arg0: i32) -> (i32, i32) {
    %c0_i32 = arith.constant 0 : i32
    %c0_i32_0 = arith.constant 0 : i32
    %c0_i32_1 = arith.constant 0 : i32
    return %c0_i32, %c0_i32_0 : i32, i32
  }
  func.func @transform_9(%arg0: i32) -> (i32, i32) {
    %c0_i32 = arith.constant 0 : i32
    %c0_i32_0 = arith.constant 0 : i32
    %c0_i32_1 = arith.constant 0 : i32
    return %c0_i32, %c0_i32_0 : i32, i32
  }
  func.func @transform_10(%arg0: i32) -> (i32, i32) {
    %c0_i32 = arith.constant 0 : i32
    %c0_i32_0 = arith.constant 0 : i32
    %c0_i32_1 = arith.constant 0 : i32
    return %c0_i32, %c0_i32_0 : i32, i32
  }
  func.func @transform_11(%arg0: i32) -> (i32, i32) {
    %c0_i32 = arith.constant 0 : i32
    %c0_i32_0 = arith.constant 0 : i32
    return %arg0, %c0_i32 : i32, i32
  }
}

</mosaic_0001>

<bundles_post_ra>
// kernel: tpu_custom_call.1
= control target key start
LH: loop header
LB: loop body
LE: loop exit
PB: predicated region body
PF: predicated region fallthrough
CT: control target
= control target key end

     0   :  { %17 = vsyncpa [#allocation4], 0  ;;  %s531_s0 = inlined_call_operand.<no memory space> [shape: f32[1], index: 0, kind: input, shape index: {}]   ;;  %s532_s1 = inlined_call_operand.hbm [shape: f32[8,64], index: 1, kind: input, shape index: {}]   ;;  %s533_s2 = inlined_call_operand.hbm [shape: f32[64,128], index: 2, kind: input, shape index: {}]   ;;  %s534_s3 = inlined_call_operand.vmem [shape: f32[1,128], index: 3, kind: input, shape index: {}]   ;;  %s535_s4 = inlined_call_operand.vmem [shape: f32[1,128], index: 4, kind: input, shape index: {}]   ;;  %s536_s5 = inlined_call_operand.hbm [shape: f32[128,128], index: 5, kind: input, shape index: {}]   ;;  %s537_s6 = inlined_call_operand.vmem [shape: f32[1,128], index: 6, kind: input, shape index: {}]   ;;  %s538_s7 = inlined_call_operand.vmem [shape: f32[1,128], index: 7, kind: input, shape index: {}]   ;;  %s539_s8 = inlined_call_operand.hbm [shape: f32[128,128], index: 8, kind: input, shape index: {}]   ;;  %s540_s9 = inlined_call_operand.vmem [shape: f32[1,128], index: 9, kind: input, shape index: {}]   ;;  %s541_s10 = inlined_call_operand.vmem [shape: f32[1,128], index: 10, kind: input, shape index: {}]   ;;  %s542_s11 = inlined_call_operand.hbm [shape: f32[8,128], index: 11, kind: output, shape index: {}]  }
   0x1   :  { %18 = vsyncpa [#allocation7], 0 }
   0x2   :  { %19 = vsyncpa [#allocation10], 0  ;;  %s38_s19 = sshll.u32 %s533_s2, 4  ;;  %s39_s19 = int_to_ptr.hbm [resolvable:$true] %s38_s19 }
   0x3   :  { %20 = vsyncpa [#allocation5], 0  ;;  %s423_s20 = smov [#allocation6]   ;;  %s28_s24 = sshll.u32 %s532_s1, 4  ;;  %s29_s24 = int_to_ptr.hbm [resolvable:$true] %s28_s24 }
   0x4   :  { %s40_s21 = sshll.u32 %s423_s20, 4  ;;  %s424_s25 = smov 128   ;;  %s41_s21 = int_to_ptr.vmem [resolvable:$true] %s40_s21 }
   0x5   :  { %s425_s26 = smov 8   ;;  %s426_s27 = smov [#allocation3]  }
   0x6   :  { %46 = dma.hbm_to_vmem [thread:$0]  %s39_s19, 1024, %s41_s21, [#allocation7], %s424_s25, %s424_s25, %s425_s26  }
   0x7   :  { %s30_s28 = sshll.u32 %s426_s27, 4  ;;  %s55_s12 = sshll.u32 %s536_s5, 4  ;;  %s31_s28 = int_to_ptr.vmem [resolvable:$true] %s30_s28  ;;  %s56_s12 = int_to_ptr.hbm [resolvable:$true] %s55_s12 }
   0x8   :  { %33 = dma.hbm_to_vmem [thread:$0]  %s29_s24, 128, %s31_s28, [#allocation4]  }
   0x9   :  { %s72_s14 = sshll.u32 %s539_s8, 4  ;;  %s427_s15 = smov [#allocation8]   ;;  %s73_s14 = int_to_ptr.hbm [resolvable:$true] %s72_s14 }
   0xa   :  { %s57_s16 = sshll.u32 %s427_s15, 4  ;;  %s428_s1 = smov [#allocation9]   ;;  %s58_s16 = int_to_ptr.vmem [resolvable:$true] %s57_s16 }
   0xb   :  { %63 = dma.hbm_to_vmem [thread:$0]  %s56_s12, 2048, %s58_s16, [#allocation7], %s424_s25, %s424_s25, %s425_s26  }
   0xc   :  { %s74_s17 = sshll.u32 %s428_s1, 4  ;;  %s75_s17 = int_to_ptr.vmem [resolvable:$true] %s74_s17 }
   0xd   :  { %80 = dma.hbm_to_vmem [thread:$0]  %s73_s14, 2048, %s75_s17, [#allocation10], %s424_s25, %s424_s25, %s425_s26  }
   0xe   :  { %415 = dma.done.wait [#allocation4], 128  }
   0xf   :  { %416 = vsyncadd [#allocation4], 4294967168 }
  0x10   :  { %417 = dma.done.wait [#allocation7], 3072  }
  0x11   :  { %418 = vsyncadd [#allocation7], 4294964224 }
  0x12   :  { %419 = dma.done.wait [#allocation10], 2048  }
  0x13   :  { %420 = vsyncadd [#allocation10], 4294965248  ;;  %v115_v0 = vld [vmem:[#allocation6 + $0x38] sm:$0xff]  ;;  %v114_v1 = vld [vmem:[#allocation6 + $0x30] sm:$0xff]  ;;  %vm119_vm0 = vcmask 523264   ;;  %v508_v21 = vstv %s531_s0  ;;  %s429_s25 = smov [#allocation11]  }
  0x14   :  { %131 = vmatpush.msra.mxu0 %v115_v0  ;;  %v113_v2 = vld [vmem:[#allocation6 + $0x28] sm:$0xff]  ;;  %v177_v3 = vld [vmem:[#allocation8 + $0x78] sm:$0xff]  ;;  %v112_v4 = vld [vmem:[#allocation6 + $0x20] sm:$0xff]  ;;  %s265_s26 = sshll.u32 %s429_s25, 4  ;;  %s267_s29 = sshll.u32 %s542_s11, 4  ;;  %s266_s26 = int_to_ptr.vmem [resolvable:$true] %s265_s26  ;;  %s268_s29 = int_to_ptr.hbm [resolvable:$true] %s267_s29 }
  0x15   :  { %181 = vmatpush.msra.mxu1 %v177_v3  ;;  %v111_v5 = vld [vmem:[#allocation6 + $0x18] sm:$0xff]  ;;  %v110_v6 = vld [vmem:[#allocation6 + $0x10] sm:$0xff]  ;;  %v109_v7 = vld [vmem:[#allocation6 + $0x8] sm:$0xff] }
  0x16   :  { %132 = vmatpush.msra.mxu0 %v114_v1  ;;  %v108_v8 = vld [vmem:[#allocation6] sm:$0xff]  ;;  %v102_v9 = vld [vmem:[#allocation3] sm:$0xff]  ;;  %v176_v10 = vld [vmem:[#allocation8 + $0x70] sm:$0xff] }
  0x17   :  { %182 = vmatpush.msra.mxu1 %v176_v10  ;;  %v175_v11 = vld [vmem:[#allocation8 + $0x68] sm:$0xff]  ;;  %v174_v12 = vld [vmem:[#allocation8 + $0x60] sm:$0xff]  ;;  %v173_v13 = vld [vmem:[#allocation8 + $0x58] sm:$0xff] }
  0x18   :  { %133 = vmatpush.msra.mxu0 %v113_v2  ;;  %v172_v14 = vld [vmem:[#allocation8 + $0x50] sm:$0xff]  ;;  %v171_v15 = vld [vmem:[#allocation8 + $0x48] sm:$0xff]  ;;  %v170_v16 = vld [vmem:[#allocation8 + $0x40] sm:$0xff] }
  0x19   :  { %183 = vmatpush.msra.mxu1 %v175_v11  ;;  %v169_v17 = vld [vmem:[#allocation8 + $0x38] sm:$0xff]  ;;  %v168_v18 = vld [vmem:[#allocation8 + $0x30] sm:$0xff]  ;;  %v167_v19 = vld [vmem:[#allocation8 + $0x28] sm:$0xff] }
  0x1a   :  { %134 = vmatpush.msra.mxu0 %v112_v4  ;;  %v104_v20 = vld [vmem:[%s535_s4] sm:$0x1]  ;;  %v166_v22 = vld [vmem:[#allocation8 + $0x20] sm:$0xff]  ;;  %v164_v26 = vld [vmem:[#allocation8 + $0x10] sm:$0xff] }
  0x1b   :  { %184 = vmatpush.msra.mxu1 %v174_v12  ;;  %v165_v23 = vld [vmem:[#allocation8 + $0x18] sm:$0xff]  ;;  %v106_v24 = vmul.f32 %v508_v21, %v104_v20  ;;  %v163_v27 = vld [vmem:[#allocation8 + $0x8] sm:$0xff]  ;;  %v162_v29 = vld [vmem:[#allocation8] sm:$0xff] }
  0x1c   :  { %135 = vmatpush.msra.mxu0 %v111_v5  ;;  %v103_v25 = vld [vmem:[%s534_s3] sm:$0x1]  ;;  %v234_v48 = vld [vmem:[#allocation9 + $0x70] sm:$0xff]  ;;  %v233_v49 = vld [vmem:[#allocation9 + $0x68] sm:$0xff] }
  0x1d   :  { %185 = vmatpush.msra.mxu1 %v173_v13  ;;  %v107_v28 = vadd.f32 %v106_v24, %v103_v25  ;;  %v235_v31 = vld [vmem:[#allocation9 + $0x78] sm:$0xff]  ;;  %v232_v50 = vld [vmem:[#allocation9 + $0x60] sm:$0xff]  ;;  %v230_v52 = vld [vmem:[#allocation9 + $0x50] sm:$0xff] }
  0x1e   :  { %136 = vmatpush.msra.mxu0 %v110_v6  ;;  %239 = vmatpush.msra.mxu2 %v235_v31  ;;  %v231_v51 = vld [vmem:[#allocation9 + $0x58] sm:$0xff]  ;;  %v229_v53 = vld [vmem:[#allocation9 + $0x48] sm:$0xff]  ;;  %v228_v54 = vld [vmem:[#allocation9 + $0x40] sm:$0xff] }
  0x1f   :  { %186 = vmatpush.msra.mxu1 %v172_v14  ;;  %v117_v30 = vperm.slane %v107_v28, 0  ;;  %v227_v55 = vld [vmem:[#allocation9 + $0x38] sm:$0xff]  ;;  %v226_v56 = vld [vmem:[#allocation9 + $0x30] sm:$0xff]  ;;  %v225_v57 = vld [vmem:[#allocation9 + $0x28] sm:$0xff] }
  0x20   :  { %137 = vmatpush.msra.mxu0 %v109_v7  ;;  %240 = vmatpush.msra.mxu2 %v234_v48  ;;  %v159_v58 = vld [vmem:[%s538_s7] sm:$0x1]  ;;  %v224_v59 = vld [vmem:[#allocation9 + $0x20] sm:$0xff]  ;;  %v222_v63 = vld [vmem:[#allocation9 + $0x10] sm:$0xff] }
  0x21   :  { %187 = vmatpush.msra.mxu1 %v171_v15  ;;  %v223_v60 = vld [vmem:[#allocation9 + $0x18] sm:$0xff]  ;;  %v160_v61 = vmul.f32 %v159_v58, %v508_v21  ;;  %v221_v0 = vld [vmem:[#allocation9 + $0x8] sm:$0xff]  ;;  %v220_v2 = vld [vmem:[#allocation9] sm:$0xff] }
  0x22   :  { %138 = vmatpush.msra.mxu0 %v108_v8  ;;  %241 = vmatpush.msra.mxu2 %v233_v49  ;;  %v158_v62 = vld [vmem:[%s537_s6] sm:$0x1] }
  0x23   :  { %279 = vmatmul.msk.f32.vlgmr.msra.gmra.mxu0 %vm119_vm0, %v102_v9  ;;  %188 = vmatpush.msra.mxu1 %v170_v16  ;;  %v161_v1 = vadd.f32 %v160_v61, %v158_v62  ;;  %v217_v20 = vld [vmem:[%s541_s10] sm:$0x1] }
  0x24   :  { %242 = vmatpush.msra.mxu2 %v232_v50 }
  0x25   :  { %189 = vmatpush.msra.mxu1 %v169_v17  ;;  %v179_v3 = vperm.slane %v161_v1, 0 }
  0x26   :  { %243 = vmatpush.msra.mxu2 %v231_v51 }
  0x27   :  { %190 = vmatpush.msra.mxu1 %v168_v18 }
  0x28   :  { %244 = vmatpush.msra.mxu2 %v230_v52 }
  0x29   :  { %191 = vmatpush.msra.mxu1 %v167_v19 }
  0x2a   :  { %245 = vmatpush.msra.mxu2 %v229_v53 }
  0x2b   :  { %192 = vmatpush.msra.mxu1 %v166_v22  ;;  %v218_v22 = vmul.f32 %v217_v20, %v508_v21 }
  0x2c   :  { %246 = vmatpush.msra.mxu2 %v228_v54 }
  0x2d   :  { %193 = vmatpush.msra.mxu1 %v165_v23  ;;  %v216_v23 = vld [vmem:[%s540_s9] sm:$0x1] }
  0x2e   :  { %247 = vmatpush.msra.mxu2 %v227_v55  ;;  %v219_v24 = vadd.f32 %v218_v22, %v216_v23 }
  0x2f   :  { %194 = vmatpush.msra.mxu1 %v164_v26 }
  0x30   :  { %248 = vmatpush.msra.mxu2 %v226_v56  ;;  %v237_v25 = vperm.slane %v219_v24, 0 }
  0x31   :  { %195 = vmatpush.msra.mxu1 %v163_v27 }
  0x32   :  { %249 = vmatpush.msra.mxu2 %v225_v57 }
  0x33   :  { %196 = vmatpush.msra.mxu1 %v162_v29 }
  0x34   :  { %250 = vmatpush.msra.mxu2 %v224_v59 }
  0x36   :  { %251 = vmatpush.msra.mxu2 %v223_v60 }
  0x38   :  { %252 = vmatpush.msra.mxu2 %v222_v63 }
  0x3a   :  { %253 = vmatpush.msra.mxu2 %v221_v0 }
  0x3c   :  { %254 = vmatpush.msra.mxu2 %v220_v2 }
  0xa0   :  { %v140_v32 = vpop.f32.mrf.mxu0 }
  0xa1   :  { %v141_v33 = vadd.f32 %v140_v32, %v117_v30 }
  0xa3   :  { %v144_v34 = vand.u32 2147483647, %v141_v33  ;;  %v143_v45 = vmax.f32 %v141_v33, 0.0 }
  0xa5   :  { %v145_v35 = vsub.f32 0.0, %v144_v34 }
  0xa7   :  { %v146_v36 = vmul.f32 1.442695, %v145_v35 }
  0xa9   :  { %287 = vpow2.f32 %v146_v36 }
  0xaf   :  { %v288_v37 = vpop.eup %287 }
  0xb0   :  { %v148_v38 = vadd.f32 1.0, %v288_v37  ;;  %v151_v39 = vmul.f32 -0.5, %v288_v37  ;;  %v154_v41 = vand.u32 2147483647, %v288_v37 }
  0xb2   :  { %289 = vlog2.f32 %v148_v38  ;;  %v152_v40 = vadd.f32 1.0, %v151_v39  ;;  %vm155_vm1 = vcmp.lt.f32.partialorder %v154_v41, 0.0004427343 }
  0xb4   :  { %v153_v44 = vmul.f32 %v288_v37, %v152_v40 }
  0xb8   :  { %v290_v42 = vpop.eup %289 }
  0xb9   :  { %v150_v43 = vmul.f32 0.6931472, %v290_v42 }
  0xbb   :  { %v156_v46 = vsel %vm155_vm1, %v153_v44, %v150_v43 }
  0xbc   :  { %v157_v47 = vadd.f32 %v156_v46, %v143_v45 }
  0xbe   :  { %197 = vmatmul.f32.vlgmr.msra.gmra.mxu1 %v157_v47 }
 0x13b   :  { %v198_v4 = vpop.f32.mrf.mxu1 }
 0x13c   :  { %v199_v5 = vadd.f32 %v198_v4, %v179_v3 }
 0x13e   :  { %v202_v6 = vand.u32 2147483647, %v199_v5  ;;  %v201_v17 = vmax.f32 %v199_v5, 0.0 }
 0x140   :  { %v203_v7 = vsub.f32 0.0, %v202_v6 }
 0x142   :  { %v204_v8 = vmul.f32 1.442695, %v203_v7 }
 0x144   :  { %291 = vpow2.f32 %v204_v8 }
 0x14a   :  { %v292_v9 = vpop.eup %291 }
 0x14b   :  { %v206_v10 = vadd.f32 1.0, %v292_v9  ;;  %v209_v11 = vmul.f32 -0.5, %v292_v9  ;;  %v212_v13 = vand.u32 2147483647, %v292_v9 }
 0x14d   :  { %293 = vlog2.f32 %v206_v10  ;;  %v210_v12 = vadd.f32 1.0, %v209_v11  ;;  %vm213_vm2 = vcmp.lt.f32.partialorder %v212_v13, 0.0004427343 }
 0x14f   :  { %v211_v16 = vmul.f32 %v292_v9, %v210_v12 }
 0x153   :  { %v294_v14 = vpop.eup %293 }
 0x154   :  { %v208_v15 = vmul.f32 0.6931472, %v294_v14 }
 0x156   :  { %v214_v18 = vsel %vm213_vm2, %v211_v16, %v208_v15 }
 0x157   :  { %v215_v19 = vadd.f32 %v214_v18, %v201_v17 }
 0x159   :  { %255 = vmatmul.f32.vlgmr.msra.gmra.mxu2 %v215_v19 }
 0x1dc   :  { %v256_v26 = vpop.f32.mrf.mxu2 }
 0x1dd   :  { %v257_v27 = vadd.f32 %v256_v26, %v237_v25 }
 0x1df   :  { %259 = vst [vmem:[#allocation11] sm:$0xff] %v257_v27 }
 0x1e0   :  { %270 = dma.vmem_to_hbm [thread:$0]  %s266_s26, 128, %s268_s29, [#allocation5]  }
 0x1e1   :  { %421 = dma.done.wait [#allocation5], 128  }
 0x1e2   :  { %422 = vsyncadd [#allocation5], 4294967168 }
 0x1e3   :  { %275 = vsyncpa [#allocation4], 1 }
 0x1e4   :  { %276 = vsyncpa [#allocation7], 1 }
 0x1e5   :  { %277 = vsyncpa [#allocation10], 1 }
 0x1e6   :  { %278 = vsyncpa [#allocation5], 1 }

</bundles_post_ra>
